<compile_context>
chip_gen: v5e
topology: v5e:2x2
jax: 0.10.0
libtpu: 0.0.40
codegen_flags: <defaults>
</compile_context>

<pallas_src>
import jax
import jax.numpy as jnp
from jax.experimental import pallas as pl
from jax.experimental.pallas import tpu as pltpu


def simplenet_kernel(x_ref, w1_ref, b1_ref, w2_ref, b2_ref, o_ref):
    # x_ref: (3, TILE) f32 in VMEM (feature-major, lane-dense).
    # w1_ref (3,3), b1_ref (3,), w2_ref (3,2), b2_ref (2,): f32 scalars in SMEM,
    # resident across all grid steps (weights stored as (in, out) = torch W.T).
    x = x_ref[...]
    x0 = x[0:1, :]
    x1 = x[1:2, :]
    x2 = x[2:3, :]

    # fc1 + LeakyReLU (negative_slope = 0.01) via VPU scalar-broadcast FMAs.
    h = []
    for j in range(3):
        hj = (w1_ref[0, j] * x0
              + w1_ref[1, j] * x1
              + w1_ref[2, j] * x2
              + b1_ref[j])
        h.append(jnp.where(hj > 0, hj, 0.01 * hj))

    # fc2
    outs = []
    for k in range(2):
        yk = (w2_ref[0, k] * h[0]
              + w2_ref[1, k] * h[1]
              + w2_ref[2, k] * h[2]
              + b2_ref[k])
        outs.append(yk)

    # (2, TILE) lane-dense store.
    o_ref[...] = jnp.concatenate(outs, axis=0).astype(o_ref.dtype)


def simplenet_forward(x, w1, b1, w2, b2, *, tile_max=64 * 1024):
    """x: arbitrary leading shape with last dim 3 (matches x.view(-1, 3)).
    w1: (3, 3) = fc1.weight.T, b1: (1, 3) or (3,),
    w2: (3, 2) = fc2.weight.T, b2: (1, 2) or (2,).
    Returns (N, 2) to match the PyTorch module's output layout."""
    x2d = x.reshape(-1, 3).astype(jnp.float32)
    n = x2d.shape[0]

    # Feature-major (lane-dense) layout for the kernel: (3, N).
    # TODO(synk): fuse this transpose into the producer (and consume the
    # (2, N) output directly) to avoid the extra HBM passes on this
    # purely bandwidth-bound op.
    xt = x2d.T

    # Tile along N: multiple of 128 lanes, capped so double-buffered
    # (3,TILE)+(2,TILE) f32 tiles stay ~8 MiB (fits v5e/v6e/v7x budgets).
    n_lanes = max(128, ((n + 127) // 128) * 128)
    tile = min(tile_max, n_lanes)
    n_pad = pl.cdiv(n, tile) * tile
    if n_pad != n:
        xt = jnp.pad(xt, ((0, 0), (0, n_pad - n)))

    w1 = jnp.asarray(w1, jnp.float32)
    b1 = jnp.asarray(b1, jnp.float32).reshape(-1)
    w2 = jnp.asarray(w2, jnp.float32)
    b2 = jnp.asarray(b2, jnp.float32).reshape(-1)

    smem = pl.BlockSpec(memory_space=pltpu.MemorySpace.SMEM)
    out = pl.pallas_call(
        simplenet_kernel,
        out_shape=jax.ShapeDtypeStruct((2, n_pad), jnp.float32),
        grid=(n_pad // tile,),
        in_specs=[
            pl.BlockSpec((3, tile), lambda i: (0, i)),  # x, streamed per tile
            smem,  # w1
            smem,  # b1
            smem,  # w2
            smem,  # b2
        ],
        out_specs=pl.BlockSpec((2, tile), lambda i: (0, i)),
        compiler_params=pltpu.CompilerParams(
            dimension_semantics=("parallel",)),
    )(xt, w1, b1, w2, b2)

    # Back to the PyTorch-shaped (N, 2) output.
    return out[:, :n].T


if __name__ == "__main__":
    key = jax.random.PRNGKey(0)
    kx, k1, k2, k3, k4 = jax.random.split(key, 5)

    # PyTorch nn.Linear shapes: fc1.weight (3,3), fc2.weight (2,3).
    # Stored transposed as (in, out) for the kernel.
    w1 = jax.random.uniform(k1, (3, 3), jnp.float32, -0.5, 0.5)   # fc1.weight.T
    b1 = jax.random.uniform(k2, (1, 3), jnp.float32, -0.5, 0.5)   # fc1.bias
    w2 = jax.random.uniform(k3, (3, 2), jnp.float32, -0.5, 0.5)   # fc2.weight.T
    b2 = jax.random.uniform(k4, (1, 2), jnp.float32, -0.5, 0.5)   # fc2.bias

    # Small input; forward implies last dim 3 (flattened to (-1, 3)).
    x = jax.random.normal(kx, (2, 4, 3), jnp.float32)

    out = simplenet_forward(x, w1, b1, w2, b2)
    out = jax.block_until_ready(out)

    # Pure-JAX reference of the same math.
    x0 = x.reshape(-1, 3)
    h = x0 @ w1 + b1
    x1 = jnp.where(h > 0, h, 0.01 * h)
    ref = x1 @ w2 + b2
    assert out.shape == (8, 2)
    assert jnp.allclose(out, ref, atol=1e-5), "mismatch vs reference"

    print("KERNEL_OK")
</pallas_src>

<mosaic_0001>
module attributes {stable_mosaic.version = 11 : i64} {
  func.func @simplenet_kernel(%arg0: i32, %arg1: memref<3x128xf32, #tpu.memory_space<vmem>>, %arg2: memref<3x3xf32, #tpu.memory_space<smem>>, %arg3: memref<3xf32, #tpu.memory_space<smem>>, %arg4: memref<3x2xf32, #tpu.memory_space<smem>>, %arg5: memref<2xf32, #tpu.memory_space<smem>>, %arg6: memref<2x128xf32, #tpu.memory_space<vmem>>) attributes {dimension_semantics = [#tpu.dimension_semantics<parallel>], iteration_bounds = array<i64: 1>, scalar_prefetch = 0 : i64, scratch_operands = 0 : i64, tpu.core_type = #tpu.core_type<tc>, window_params = [{transform_indices = @transform_0, window_bounds = array<i64: 3, 128>}, {transform_indices = @transform_1, window_bounds = array<i64: 3, 3>}, {transform_indices = @transform_2, window_bounds = array<i64: 3>}, {transform_indices = @transform_3, window_bounds = array<i64: 3, 2>}, {transform_indices = @transform_4, window_bounds = array<i64: 2>}, {transform_indices = @transform_5, window_bounds = array<i64: 2, 128>}]} {
    %c0 = arith.constant 0 : index
    %c0_0 = arith.constant 0 : index
    %0 = vector.load %arg1[%c0, %c0_0] : memref<3x128xf32, #tpu.memory_space<vmem>>, vector<3x128xf32>
    %1 = vector.extract_strided_slice %0 {offsets = [0, 0], sizes = [1, 128], strides = [1, 1]} : vector<3x128xf32> to vector<1x128xf32>
    %2 = vector.extract_strided_slice %0 {offsets = [1, 0], sizes = [1, 128], strides = [1, 1]} : vector<3x128xf32> to vector<1x128xf32>
    %3 = vector.extract_strided_slice %0 {offsets = [2, 0], sizes = [1, 128], strides = [1, 1]} : vector<3x128xf32> to vector<1x128xf32>
    %c0_1 = arith.constant 0 : index
    %c0_2 = arith.constant 0 : index
    %4 = memref.load %arg2[%c0_1, %c0_2] : memref<3x3xf32, #tpu.memory_space<smem>>
    %5 = vector.broadcast %4 : f32 to vector<1x128xf32>
    %6 = arith.mulf %5, %1 : vector<1x128xf32>
    %c1 = arith.constant 1 : index
    %c0_3 = arith.constant 0 : index
    %7 = memref.load %arg2[%c1, %c0_3] : memref<3x3xf32, #tpu.memory_space<smem>>
    %8 = vector.broadcast %7 : f32 to vector<1x128xf32>
    %9 = arith.mulf %8, %2 : vector<1x128xf32>
    %10 = arith.addf %6, %9 : vector<1x128xf32>
    %c2 = arith.constant 2 : index
    %c0_4 = arith.constant 0 : index
    %11 = memref.load %arg2[%c2, %c0_4] : memref<3x3xf32, #tpu.memory_space<smem>>
    %12 = vector.broadcast %11 : f32 to vector<1x128xf32>
    %13 = arith.mulf %12, %3 : vector<1x128xf32>
    %14 = arith.addf %10, %13 : vector<1x128xf32>
    %c0_5 = arith.constant 0 : index
    %15 = memref.load %arg3[%c0_5] : memref<3xf32, #tpu.memory_space<smem>>
    %16 = vector.broadcast %15 : f32 to vector<1x128xf32>
    %17 = arith.addf %14, %16 : vector<1x128xf32>
    %cst = arith.constant 0.000000e+00 : f32
    %18 = vector.broadcast %cst : f32 to vector<1x128xf32>
    %19 = arith.cmpf ogt, %17, %18 : vector<1x128xf32>
    %cst_6 = arith.constant 0.00999999977 : f32
    %20 = vector.broadcast %cst_6 : f32 to vector<1x128xf32>
    %21 = arith.mulf %20, %17 : vector<1x128xf32>
    %22 = arith.select %19, %17, %21 : vector<1x128xi1>, vector<1x128xf32>
    %c0_7 = arith.constant 0 : index
    %c1_8 = arith.constant 1 : index
    %23 = memref.load %arg2[%c0_7, %c1_8] : memref<3x3xf32, #tpu.memory_space<smem>>
    %24 = vector.broadcast %23 : f32 to vector<1x128xf32>
    %25 = arith.mulf %24, %1 : vector<1x128xf32>
    %c1_9 = arith.constant 1 : index
    %c1_10 = arith.constant 1 : index
    %26 = memref.load %arg2[%c1_9, %c1_10] : memref<3x3xf32, #tpu.memory_space<smem>>
    %27 = vector.broadcast %26 : f32 to vector<1x128xf32>
    %28 = arith.mulf %27, %2 : vector<1x128xf32>
    %29 = arith.addf %25, %28 : vector<1x128xf32>
    %c2_11 = arith.constant 2 : index
    %c1_12 = arith.constant 1 : index
    %30 = memref.load %arg2[%c2_11, %c1_12] : memref<3x3xf32, #tpu.memory_space<smem>>
    %31 = vector.broadcast %30 : f32 to vector<1x128xf32>
    %32 = arith.mulf %31, %3 : vector<1x128xf32>
    %33 = arith.addf %29, %32 : vector<1x128xf32>
    %c1_13 = arith.constant 1 : index
    %34 = memref.load %arg3[%c1_13] : memref<3xf32, #tpu.memory_space<smem>>
    %35 = vector.broadcast %34 : f32 to vector<1x128xf32>
    %36 = arith.addf %33, %35 : vector<1x128xf32>
    %cst_14 = arith.constant 0.000000e+00 : f32
    %37 = vector.broadcast %cst_14 : f32 to vector<1x128xf32>
    %38 = arith.cmpf ogt, %36, %37 : vector<1x128xf32>
    %cst_15 = arith.constant 0.00999999977 : f32
    %39 = vector.broadcast %cst_15 : f32 to vector<1x128xf32>
    %40 = arith.mulf %39, %36 : vector<1x128xf32>
    %41 = arith.select %38, %36, %40 : vector<1x128xi1>, vector<1x128xf32>
    %c0_16 = arith.constant 0 : index
    %c2_17 = arith.constant 2 : index
    %42 = memref.load %arg2[%c0_16, %c2_17] : memref<3x3xf32, #tpu.memory_space<smem>>
    %43 = vector.broadcast %42 : f32 to vector<1x128xf32>
    %44 = arith.mulf %43, %1 : vector<1x128xf32>
    %c1_18 = arith.constant 1 : index
    %c2_19 = arith.constant 2 : index
    %45 = memref.load %arg2[%c1_18, %c2_19] : memref<3x3xf32, #tpu.memory_space<smem>>
    %46 = vector.broadcast %45 : f32 to vector<1x128xf32>
    %47 = arith.mulf %46, %2 : vector<1x128xf32>
    %48 = arith.addf %44, %47 : vector<1x128xf32>
    %c2_20 = arith.constant 2 : index
    %c2_21 = arith.constant 2 : index
    %49 = memref.load %arg2[%c2_20, %c2_21] : memref<3x3xf32, #tpu.memory_space<smem>>
    %50 = vector.broadcast %49 : f32 to vector<1x128xf32>
    %51 = arith.mulf %50, %3 : vector<1x128xf32>
    %52 = arith.addf %48, %51 : vector<1x128xf32>
    %c2_22 = arith.constant 2 : index
    %53 = memref.load %arg3[%c2_22] : memref<3xf32, #tpu.memory_space<smem>>
    %54 = vector.broadcast %53 : f32 to vector<1x128xf32>
    %55 = arith.addf %52, %54 : vector<1x128xf32>
    %cst_23 = arith.constant 0.000000e+00 : f32
    %56 = vector.broadcast %cst_23 : f32 to vector<1x128xf32>
    %57 = arith.cmpf ogt, %55, %56 : vector<1x128xf32>
    %cst_24 = arith.constant 0.00999999977 : f32
    %58 = vector.broadcast %cst_24 : f32 to vector<1x128xf32>
    %59 = arith.mulf %58, %55 : vector<1x128xf32>
    %60 = arith.select %57, %55, %59 : vector<1x128xi1>, vector<1x128xf32>
    %c0_25 = arith.constant 0 : index
    %c0_26 = arith.constant 0 : index
    %61 = memref.load %arg4[%c0_25, %c0_26] : memref<3x2xf32, #tpu.memory_space<smem>>
    %62 = vector.broadcast %61 : f32 to vector<1x128xf32>
    %63 = arith.mulf %62, %22 : vector<1x128xf32>
    %c1_27 = arith.constant 1 : index
    %c0_28 = arith.constant 0 : index
    %64 = memref.load %arg4[%c1_27, %c0_28] : memref<3x2xf32, #tpu.memory_space<smem>>
    %65 = vector.broadcast %64 : f32 to vector<1x128xf32>
    %66 = arith.mulf %65, %41 : vector<1x128xf32>
    %67 = arith.addf %63, %66 : vector<1x128xf32>
    %c2_29 = arith.constant 2 : index
    %c0_30 = arith.constant 0 : index
    %68 = memref.load %arg4[%c2_29, %c0_30] : memref<3x2xf32, #tpu.memory_space<smem>>
    %69 = vector.broadcast %68 : f32 to vector<1x128xf32>
    %70 = arith.mulf %69, %60 : vector<1x128xf32>
    %71 = arith.addf %67, %70 : vector<1x128xf32>
    %c0_31 = arith.constant 0 : index
    %72 = memref.load %arg5[%c0_31] : memref<2xf32, #tpu.memory_space<smem>>
    %73 = vector.broadcast %72 : f32 to vector<1x128xf32>
    %74 = arith.addf %71, %73 : vector<1x128xf32>
    %c0_32 = arith.constant 0 : index
    %c1_33 = arith.constant 1 : index
    %75 = memref.load %arg4[%c0_32, %c1_33] : memref<3x2xf32, #tpu.memory_space<smem>>
    %76 = vector.broadcast %75 : f32 to vector<1x128xf32>
    %77 = arith.mulf %76, %22 : vector<1x128xf32>
    %c1_34 = arith.constant 1 : index
    %c1_35 = arith.constant 1 : index
    %78 = memref.load %arg4[%c1_34, %c1_35] : memref<3x2xf32, #tpu.memory_space<smem>>
    %79 = vector.broadcast %78 : f32 to vector<1x128xf32>
    %80 = arith.mulf %79, %41 : vector<1x128xf32>
    %81 = arith.addf %77, %80 : vector<1x128xf32>
    %c2_36 = arith.constant 2 : index
    %c1_37 = arith.constant 1 : index
    %82 = memref.load %arg4[%c2_36, %c1_37] : memref<3x2xf32, #tpu.memory_space<smem>>
    %83 = vector.broadcast %82 : f32 to vector<1x128xf32>
    %84 = arith.mulf %83, %60 : vector<1x128xf32>
    %85 = arith.addf %81, %84 : vector<1x128xf32>
    %c1_38 = arith.constant 1 : index
    %86 = memref.load %arg5[%c1_38] : memref<2xf32, #tpu.memory_space<smem>>
    %87 = vector.broadcast %86 : f32 to vector<1x128xf32>
    %88 = arith.addf %85, %87 : vector<1x128xf32>
    %89 = tpu.concatenate %74, %88 in 0 : vector<1x128xf32>, vector<1x128xf32> -> vector<2x128xf32>
    %c0_39 = arith.constant 0 : index
    %c0_40 = arith.constant 0 : index
    %90 = vector.load %arg6[%c0_39, %c0_40] : memref<2x128xf32, #tpu.memory_space<vmem>>, vector<2x128xf32>
    tpu.vector_store %arg6[%c0_39, %c0_40], %89 {strides = array<i32>} : memref<2x128xf32, #tpu.memory_space<vmem>>, vector<2x128xf32>,
    return
  }
  func.func @transform_0(%arg0: i32) -> (i32, i32) {
    %c0_i32 = arith.constant 0 : i32
    %c0_i32_0 = arith.constant 0 : i32
    return %c0_i32, %arg0 : i32, i32
  }
  func.func @transform_1(%arg0: i32) -> (i32, i32) {
    %c0_i32 = arith.constant 0 : i32
    %c0_i32_0 = arith.constant 0 : i32
    %c0_i32_1 = arith.constant 0 : i32
    return %c0_i32, %c0_i32_0 : i32, i32
  }
  func.func @transform_2(%arg0: i32) -> i32 {
    %c0_i32 = arith.constant 0 : i32
    %c0_i32_0 = arith.constant 0 : i32
    return %c0_i32 : i32
  }
  func.func @transform_3(%arg0: i32) -> (i32, i32) {
    %c0_i32 = arith.constant 0 : i32
    %c0_i32_0 = arith.constant 0 : i32
    %c0_i32_1 = arith.constant 0 : i32
    return %c0_i32, %c0_i32_0 : i32, i32
  }
  func.func @transform_4(%arg0: i32) -> i32 {
    %c0_i32 = arith.constant 0 : i32
    %c0_i32_0 = arith.constant 0 : i32
    return %c0_i32 : i32
  }
  func.func @transform_5(%arg0: i32) -> (i32, i32) {
    %c0_i32 = arith.constant 0 : i32
    %c0_i32_0 = arith.constant 0 : i32
    return %c0_i32, %arg0 : i32, i32
  }
}

</mosaic_0001>

<bundles_post_ra>
// kernel: tpu_custom_call.1
= control target key start
LH: loop header
LB: loop body
LE: loop exit
PB: predicated region body
PF: predicated region fallthrough
CT: control target
= control target key end

     0   :  { %10 = vsyncpa [#allocation4], 0  ;;  %s364_s0 = inlined_call_operand.vmem [shape: f32[3,128], index: 0, kind: input, shape index: {}]   ;;  %s365_s1 = inlined_call_operand.hbm [shape: f32[3,3], index: 1, kind: input, shape index: {}]   ;;  %s366_s2 = inlined_call_operand.vmem [shape: f32[3], index: 2, kind: input, shape index: {}]   ;;  %s367_s3 = inlined_call_operand.vmem [shape: f32[3,2], index: 3, kind: input, shape index: {}]   ;;  %s368_s4 = inlined_call_operand.vmem [shape: f32[2], index: 4, kind: input, shape index: {}]   ;;  %s369_s5 = inlined_call_operand.hbm [shape: f32[2,128], index: 5, kind: output, shape index: {}]  }
   0x1   :  { %11 = vsyncpa [#allocation5], 0 }
   0x2   :  { %12 = vsyncpa [#allocation8], 0  ;;  %s39_s20 = sshll.u32 %s367_s3, 4  ;;  %s40_s20 = int_to_ptr.vmem [resolvable:$true] %s39_s20 }
   0x3   :  { %13 = vsyncpa [#allocation3], 0  ;;  %s21_s23 = sshll.u32 %s365_s1, 4  ;;  %s293_s24 = smov [#allocation7]   ;;  %s22_s23 = int_to_ptr.hbm [resolvable:$true] %s21_s23 }
   0x4   :  { %42 = dma.vmem_to_smem %s40_s20, 64, %s293_s24, [#allocation8]  }
   0x5   :  { %s294_s25 = smov [#allocation2]   ;;  %s30_s28 = sshll.u32 %s366_s2, 4  ;;  %s31_s28 = int_to_ptr.vmem [resolvable:$true] %s30_s28 }
   0x6   :  { %24 = dma.hbm_to_smem %s22_s23, 64, %s294_s25, [#allocation4]  }
   0x7   :  { %s48_s3 = sshll.u32 %s368_s4, 4  ;;  %s295_s6 = smov [#allocation6]   ;;  %s49_s3 = int_to_ptr.vmem [resolvable:$true] %s48_s3 }
   0x8   :  { %33 = dma.vmem_to_smem %s31_s28, 16, %s295_s6, [#allocation5]  }
   0x9   :  { %s296_s7 = smov [#allocation9]  }
   0xa   :  { %51 = dma.vmem_to_smem %s49_s3, 16, %s296_s7, [#allocation8]  }
   0xb   :  { %285 = dma.done.wait [#allocation4], 64  }
   0xc   :  { %286 = vsyncadd [#allocation4], 4294967232 }
   0xd   :  { %287 = dma.done.wait [#allocation5], 16  }
   0xe   :  { %288 = vsyncadd [#allocation5], 4294967280 }
   0xf   :  { %289 = dma.done.wait [#allocation8], 80  }
  0x10   :  { %290 = vsyncadd [#allocation8], 4294967216 }
  0x11   :  { %68 = sfence }
  0x12   :  { %s70_s1 = sld [smem:[#allocation2]]  ;;  %v69_v0 = vld [vmem:[%s364_s0] sm:$0x7]  ;;  %s297_s26 = smov [#allocation10]   ;;  %vm170_vm3 = vcmask 1040384  }
  0x13   :  { %s192_s8 = sld [smem:[#allocation2 + $0x80]]  ;;  %s178_s27 = sshll.u32 %s297_s26, 4  ;;  %s179_s27 = int_to_ptr.vmem [resolvable:$true] %s178_s27 }
  0x14   :  { %s193_s2 = sld [smem:[#allocation2 + $0x100]]  ;;  %s180_s30 = sshll.u32 %s369_s5, 4  ;;  %s181_s30 = int_to_ptr.hbm [resolvable:$true] %s180_s30 }
  0x15   :  { %s340_s9 = sld [smem:[#allocation6]] }
  0x16   :  { %s194_s10 = sld [smem:[#allocation2 + $0x1]] }
  0x17   :  { %s195_s12 = sld [smem:[#allocation2 + $0x81]] }
  0x18   :  { %v71_v1 = vstv %s70_s1  ;;  %s196_s13 = sld [smem:[#allocation2 + $0x101]] }
  0x19   :  { %v74_v2 = vstv %s192_s8  ;;  %s345_s14 = sld [smem:[#allocation6 + $0x1]]  ;;  %v72_v3 = vmul.f32 %v71_v1, %v69_v0 }
  0x1a   :  { %v75_v4 = vmul.f32 %v74_v2, %v69_v0  ;;  %v81_v5 = vstv %s193_s2  ;;  %s198_s15 = sld [smem:[#allocation2 + $0x2]] }
  0x1b   :  { %v82_v6 = vmul.f32 %v81_v5, %v69_v0  ;;  %s199_s16 = sld [smem:[#allocation2 + $0x82]]  ;;  %v88_v15 = vstv %s340_s9 }
  0x1c   :  { %v77_v7 = vrot.slane %v75_v4, 1  ;;  %v94_v8 = vstv %s194_s10  ;;  %s200_s17 = sld [smem:[#allocation2 + $0x102]] }
  0x1d   :  { %v84_v9 = vrot.slane %v82_v6, 2  ;;  %v97_v10 = vstv %s195_s12  ;;  %s347_s18 = sld [smem:[#allocation6 + $0x2]]  ;;  %v95_v12 = vmul.f32 %v94_v8, %v69_v0 }
  0x1e   :  { %v79_v11 = vadd.f32 %v77_v7, %v72_v3  ;;  %v98_v13 = vmul.f32 %v97_v10, %v69_v0  ;;  %v104_v14 = vstv %s196_s13  ;;  %s349_s0 = sld [smem:[#allocation7]] }
  0x1f   :  { %v105_v16 = vmul.f32 %v104_v14, %v69_v0  ;;  %s352_s19 = sld [smem:[#allocation7 + $0x80]]  ;;  %v111_v27 = vstv %s345_s14 }
  0x20   :  { %v86_v17 = vadd.f32 %v84_v9, %v79_v11  ;;  %v100_v18 = vrot.slane %v98_v13, 1  ;;  %v117_v19 = vstv %s198_s15  ;;  %s354_s20 = sld [smem:[#allocation7 + $0x100]] }
  0x21   :  { %v107_v20 = vrot.slane %v105_v16, 2  ;;  %v118_v21 = vmul.f32 %v117_v19, %v69_v0  ;;  %v120_v22 = vstv %s199_s16  ;;  %s204_s21 = sld [smem:[#allocation7 + $0x1]] }
  0x22   :  { %v89_v23 = vadd.f32 %v88_v15, %v86_v17  ;;  %v102_v24 = vadd.f32 %v100_v18, %v95_v12  ;;  %v121_v25 = vmul.f32 %v120_v22, %v69_v0  ;;  %v127_v26 = vstv %s200_s17  ;;  %s205_s22 = sld [smem:[#allocation7 + $0x81]] }
  0x23   :  { %v128_v28 = vmul.f32 %v127_v26, %v69_v0  ;;  %s206_s23 = sld [smem:[#allocation7 + $0x101]]  ;;  %v134_v37 = vstv %s347_s18 }
  0x24   :  { %vm90_vm0 = vcmp.gt.f32.partialorder %v89_v23, 0.0  ;;  %v91_v29 = vmul.f32 0.01, %v89_v23  ;;  %v109_v30 = vadd.f32 %v107_v20, %v102_v24  ;;  %v123_v31 = vrot.slane %v121_v25, 1  ;;  %s150_s24 = sld [smem:[#allocation9]] }
  0x25   :  { %v130_v32 = vrot.slane %v128_v28, 2  ;;  %v140_v36 = vstv %s349_s0  ;;  %v143_v38 = vstv %s352_s19  ;;  %s207_s25 = sld [smem:[#allocation9 + $0x1]] }
  0x26   :  { %v92_v33 = vsel %vm90_vm0, %v89_v23, %v91_v29  ;;  %v112_v34 = vadd.f32 %v111_v27, %v109_v30  ;;  %v125_v35 = vadd.f32 %v123_v31, %v118_v21  ;;  %v147_v50 = vstv %s354_s20 }
  0x27   :  { %v154_v41 = vstv %s204_s21  ;;  %v141_v42 = vmul.f32 %v140_v36, %v92_v33 }
  0x28   :  { %vm113_vm1 = vcmp.gt.f32.partialorder %v112_v34, 0.0  ;;  %v114_v39 = vmul.f32 0.01, %v112_v34  ;;  %v132_v40 = vadd.f32 %v130_v32, %v125_v35  ;;  %v155_v43 = vmul.f32 %v154_v41, %v92_v33 }
  0x29   :  { %v157_v44 = vstv %s205_s22  ;;  %v161_v51 = vstv %s206_s23 }
  0x2a   :  { %v115_v45 = vsel %vm113_vm1, %v112_v34, %v114_v39  ;;  %v135_v46 = vadd.f32 %v134_v37, %v132_v40  ;;  %v151_v57 = vstv %s150_s24 }
  0x2b   :  { %v144_v47 = vmul.f32 %v143_v38, %v115_v45  ;;  %v158_v48 = vmul.f32 %v157_v44, %v115_v45  ;;  %v165_v58 = vstv %s207_s25 }
  0x2c   :  { %vm136_vm2 = vcmp.gt.f32.partialorder %v135_v46, 0.0  ;;  %v137_v49 = vmul.f32 0.01, %v135_v46 }
  0x2d   :  { %v145_v52 = vadd.f32 %v144_v47, %v141_v42  ;;  %v159_v53 = vadd.f32 %v158_v48, %v155_v43 }
  0x2e   :  { %v138_v54 = vsel %vm136_vm2, %v135_v46, %v137_v49 }
  0x2f   :  { %v148_v55 = vmul.f32 %v147_v50, %v138_v54  ;;  %v162_v56 = vmul.f32 %v161_v51, %v138_v54 }
  0x31   :  { %v149_v59 = vadd.f32 %v148_v55, %v145_v52  ;;  %v163_v60 = vadd.f32 %v162_v56, %v159_v53 }
  0x33   :  { %v152_v61 = vadd.f32 %v151_v57, %v149_v59  ;;  %v166_v62 = vadd.f32 %v165_v58, %v163_v60 }
  0x35   :  { %v168_v63 = vrot.slane %v166_v62, 7 }
  0x37   :  { %v171_v0 = vsel %vm170_vm3, %v152_v61, %v168_v63 }
  0x38   :  { %172 = vst [vmem:[#allocation10] sm:$0x3] %v171_v0 }
  0x39   :  { %183 = dma.vmem_to_hbm [thread:$0]  %s179_s27, 32, %s181_s30, [#allocation3]  }
  0x3a   :  { %291 = dma.done.wait [#allocation3], 32  }
  0x3b   :  { %292 = vsyncadd [#allocation3], 4294967264 }
  0x3c   :  { %188 = vsyncpa [#allocation3], 1 }
  0x3d   :  { %189 = vsyncpa [#allocation4], 1 }
  0x3e   :  { %190 = vsyncpa [#allocation5], 1 }
  0x3f   :  { %191 = vsyncpa [#allocation8], 1 }

</bundles_post_ra>
